<compile_context>
chip_gen: v7x
topology: tpu7x:2x2x1
jax: 0.10.0
libtpu: 0.0.40
codegen_flags: <defaults>
</compile_context>

<pallas_src>
import jax
import jax.numpy as jnp
from jax.experimental import pallas as pl
from jax.experimental.pallas import tpu as pltpu

LANES = 128

# Flat params layout (33 f32 scalars in SMEM):
#   [0:8]   = W1[0, :]   (input feature 0 -> 8 hidden)
#   [8:16]  = W1[1, :]   (input feature 1 -> 8 hidden)
#   [16:24] = b1
#   [24:32] = W2[:, 0]
#   [32]    = b2
def value_kernel(params_ref, x_ref, o_ref):
    # x_ref: (2, TBr, 128)  — feature index on the leading (squeeze-indexed) axis,
    #                         batch spread densely over sublanes x lanes.
    # o_ref: (TBr, 128)
    x0 = x_ref[0]  # (TBr, 128)
    x1 = x_ref[1]  # (TBr, 128)

    y = jnp.zeros_like(x0)
    for j in range(8):  # fully unrolled: 8 hidden units, pure VPU + EUP work
        h_j = jnp.tanh(x0 * params_ref[j] + x1 * params_ref[8 + j] + params_ref[16 + j])
        y = y + h_j * params_ref[24 + j]
    o_ref[...] = y + params_ref[32]


def value_forward(x, w1, b1, w2, b2, *, block_rows=512):
    """x: (B, 2) f32. Returns (B, 1) f32 = tanh(x @ w1 + b1) @ w2 + b2."""
    B = x.shape[0]

    # Flatten the 33 weight/bias scalars into one SMEM-resident vector.
    params = jnp.concatenate(
        [w1.reshape(-1), b1.reshape(-1), w2.reshape(-1), b2.reshape(-1)]
    ).astype(jnp.float32)

    # Dense (rows, 128) batch layout; tile rows a multiple of 8 (sublane rule).
    rows = pl.cdiv(B, LANES)
    tbr = min(int(block_rows), pl.cdiv(rows, 8) * 8)
    tbr = max(8, (tbr // 8) * 8)                       # guard: multiple of 8, >= 8
    padded_rows = pl.cdiv(rows, tbr) * tbr
    padded_B = padded_rows * LANES
    grid = (padded_rows // tbr,)

    # Single fusable pad (instead of zeros + scatter), then a free reshape to
    # (2, rows, 128).  Padded tail produces finite garbage, sliced off below.
    xt = jnp.pad(x.astype(jnp.float32).T, ((0, 0), (0, padded_B - B)))
    xr = xt.reshape(2, padded_rows, LANES)

    out = pl.pallas_call(
        value_kernel,
        out_shape=jax.ShapeDtypeStruct((padded_rows, LANES), jnp.float32),
        grid=grid,
        in_specs=[
            pl.BlockSpec(memory_space=pltpu.MemorySpace.SMEM),        # params (whole, SMEM)
            pl.BlockSpec((2, tbr, LANES), lambda i: (0, i, 0)),        # x tile (2, TBr, 128)
        ],
        out_specs=pl.BlockSpec((tbr, LANES), lambda i: (i, 0)),        # dense (TBr, 128) output
        compiler_params=pltpu.CompilerParams(
            dimension_semantics=("parallel",),
        ),
        cost_estimate=pl.CostEstimate(
            flops=50 * padded_B, transcendentals=8 * padded_B,
            bytes_accessed=12 * padded_B,
        ),
    )(params, xr)

    # (rows, 128) row-major flatten puts batch element i at index i; slice + reshape.
    return out.reshape(padded_B)[:B].reshape(B, 1)


def init_params(key):
    # Deterministic synthetic init mimicking nn.Linear's U(-1/sqrt(fan_in), +1/sqrt(fan_in)).
    k1, k2, k3, k4 = jax.random.split(key, 4)
    bound1 = 1.0 / (2.0 ** 0.5)   # fan_in = 2
    bound2 = 1.0 / (8.0 ** 0.5)   # fan_in = 8
    w1 = jax.random.uniform(k1, (2, 8), jnp.float32, -bound1, bound1)   # fc1.weight.T
    b1 = jax.random.uniform(k2, (8,),  jnp.float32, -bound1, bound1)    # fc1.bias
    w2 = jax.random.uniform(k3, (8, 1), jnp.float32, -bound2, bound2)   # fc2.weight.T
    b2 = jax.random.uniform(k4, (1,),  jnp.float32, -bound2, bound2)    # fc2.bias
    return w1, b1, w2, b2


# TODO(synk): train_model (Adam + MSE training loop) has no Pallas forward-pass
# equivalent here; only the forward is implemented.

if __name__ == "__main__":
    key = jax.random.PRNGKey(0)
    kx, kp = jax.random.split(key)

    B = 8
    x = jax.random.normal(kx, (B, 2), jnp.float32)
    w1, b1, w2, b2 = init_params(kp)

    out = value_forward(x, w1, b1, w2, b2)
    out = jax.block_until_ready(out)

    # Pure-JAX reference check of the forward pass.
    ref = jnp.tanh(x @ w1 + b1) @ w2 + b2
    assert out.shape == (B, 1)
    assert jnp.allclose(out, ref, atol=1e-5, rtol=1e-5)

    print("KERNEL_OK")
</pallas_src>

<mosaic_0001>
module attributes {stable_mosaic.version = 11 : i64} {
  func.func @value_kernel(%arg0: i32, %arg1: memref<33xf32, #tpu.memory_space<smem>>, %arg2: memref<2x8x128xf32, #tpu.memory_space<vmem>>, %arg3: memref<8x128xf32, #tpu.memory_space<vmem>>) attributes {dimension_semantics = [#tpu.dimension_semantics<parallel>], iteration_bounds = array<i64: 1>, scalar_prefetch = 0 : i64, scratch_operands = 0 : i64, tpu.core_type = #tpu.core_type<tc>, window_params = [{transform_indices = @transform_0, window_bounds = array<i64: 33>}, {transform_indices = @transform_1, window_bounds = array<i64: 2, 8, 128>}, {transform_indices = @transform_2, window_bounds = array<i64: 8, 128>}]} {
    %c0 = arith.constant 0 : index
    %c0_0 = arith.constant 0 : index
    %c0_1 = arith.constant 0 : index
    %0 = vector.load %arg2[%c0, %c0_0, %c0_1] : memref<2x8x128xf32, #tpu.memory_space<vmem>>, vector<1x8x128xf32>
    %1 = vector.shape_cast %0 : vector<1x8x128xf32> to vector<8x128xf32>
    %c1 = arith.constant 1 : index
    %c0_2 = arith.constant 0 : index
    %c0_3 = arith.constant 0 : index
    %2 = vector.load %arg2[%c1, %c0_2, %c0_3] : memref<2x8x128xf32, #tpu.memory_space<vmem>>, vector<1x8x128xf32>
    %3 = vector.shape_cast %2 : vector<1x8x128xf32> to vector<8x128xf32>
    %cst = arith.constant 0.000000e+00 : f32
    %4 = vector.broadcast %cst : f32 to vector<8x128xf32>
    %c0_4 = arith.constant 0 : index
    %5 = memref.load %arg1[%c0_4] : memref<33xf32, #tpu.memory_space<smem>>
    %6 = vector.broadcast %5 : f32 to vector<8x128xf32>
    %7 = arith.mulf %1, %6 : vector<8x128xf32>
    %c8 = arith.constant 8 : index
    %8 = memref.load %arg1[%c8] : memref<33xf32, #tpu.memory_space<smem>>
    %9 = vector.broadcast %8 : f32 to vector<8x128xf32>
    %10 = arith.mulf %3, %9 : vector<8x128xf32>
    %11 = arith.addf %7, %10 : vector<8x128xf32>
    %c16 = arith.constant 16 : index
    %12 = memref.load %arg1[%c16] : memref<33xf32, #tpu.memory_space<smem>>
    %13 = vector.broadcast %12 : f32 to vector<8x128xf32>
    %14 = arith.addf %11, %13 : vector<8x128xf32>
    %15 = math.tanh %14 : vector<8x128xf32>
    %c24 = arith.constant 24 : index
    %16 = memref.load %arg1[%c24] : memref<33xf32, #tpu.memory_space<smem>>
    %17 = vector.broadcast %16 : f32 to vector<8x128xf32>
    %18 = arith.mulf %15, %17 : vector<8x128xf32>
    %19 = arith.addf %4, %18 : vector<8x128xf32>
    %c1_5 = arith.constant 1 : index
    %20 = memref.load %arg1[%c1_5] : memref<33xf32, #tpu.memory_space<smem>>
    %21 = vector.broadcast %20 : f32 to vector<8x128xf32>
    %22 = arith.mulf %1, %21 : vector<8x128xf32>
    %c9 = arith.constant 9 : index
    %23 = memref.load %arg1[%c9] : memref<33xf32, #tpu.memory_space<smem>>
    %24 = vector.broadcast %23 : f32 to vector<8x128xf32>
    %25 = arith.mulf %3, %24 : vector<8x128xf32>
    %26 = arith.addf %22, %25 : vector<8x128xf32>
    %c17 = arith.constant 17 : index
    %27 = memref.load %arg1[%c17] : memref<33xf32, #tpu.memory_space<smem>>
    %28 = vector.broadcast %27 : f32 to vector<8x128xf32>
    %29 = arith.addf %26, %28 : vector<8x128xf32>
    %30 = math.tanh %29 : vector<8x128xf32>
    %c25 = arith.constant 25 : index
    %31 = memref.load %arg1[%c25] : memref<33xf32, #tpu.memory_space<smem>>
    %32 = vector.broadcast %31 : f32 to vector<8x128xf32>
    %33 = arith.mulf %30, %32 : vector<8x128xf32>
    %34 = arith.addf %19, %33 : vector<8x128xf32>
    %c2 = arith.constant 2 : index
    %35 = memref.load %arg1[%c2] : memref<33xf32, #tpu.memory_space<smem>>
    %36 = vector.broadcast %35 : f32 to vector<8x128xf32>
    %37 = arith.mulf %1, %36 : vector<8x128xf32>
    %c10 = arith.constant 10 : index
    %38 = memref.load %arg1[%c10] : memref<33xf32, #tpu.memory_space<smem>>
    %39 = vector.broadcast %38 : f32 to vector<8x128xf32>
    %40 = arith.mulf %3, %39 : vector<8x128xf32>
    %41 = arith.addf %37, %40 : vector<8x128xf32>
    %c18 = arith.constant 18 : index
    %42 = memref.load %arg1[%c18] : memref<33xf32, #tpu.memory_space<smem>>
    %43 = vector.broadcast %42 : f32 to vector<8x128xf32>
    %44 = arith.addf %41, %43 : vector<8x128xf32>
    %45 = math.tanh %44 : vector<8x128xf32>
    %c26 = arith.constant 26 : index
    %46 = memref.load %arg1[%c26] : memref<33xf32, #tpu.memory_space<smem>>
    %47 = vector.broadcast %46 : f32 to vector<8x128xf32>
    %48 = arith.mulf %45, %47 : vector<8x128xf32>
    %49 = arith.addf %34, %48 : vector<8x128xf32>
    %c3 = arith.constant 3 : index
    %50 = memref.load %arg1[%c3] : memref<33xf32, #tpu.memory_space<smem>>
    %51 = vector.broadcast %50 : f32 to vector<8x128xf32>
    %52 = arith.mulf %1, %51 : vector<8x128xf32>
    %c11 = arith.constant 11 : index
    %53 = memref.load %arg1[%c11] : memref<33xf32, #tpu.memory_space<smem>>
    %54 = vector.broadcast %53 : f32 to vector<8x128xf32>
    %55 = arith.mulf %3, %54 : vector<8x128xf32>
    %56 = arith.addf %52, %55 : vector<8x128xf32>
    %c19 = arith.constant 19 : index
    %57 = memref.load %arg1[%c19] : memref<33xf32, #tpu.memory_space<smem>>
    %58 = vector.broadcast %57 : f32 to vector<8x128xf32>
    %59 = arith.addf %56, %58 : vector<8x128xf32>
    %60 = math.tanh %59 : vector<8x128xf32>
    %c27 = arith.constant 27 : index
    %61 = memref.load %arg1[%c27] : memref<33xf32, #tpu.memory_space<smem>>
    %62 = vector.broadcast %61 : f32 to vector<8x128xf32>
    %63 = arith.mulf %60, %62 : vector<8x128xf32>
    %64 = arith.addf %49, %63 : vector<8x128xf32>
    %c4 = arith.constant 4 : index
    %65 = memref.load %arg1[%c4] : memref<33xf32, #tpu.memory_space<smem>>
    %66 = vector.broadcast %65 : f32 to vector<8x128xf32>
    %67 = arith.mulf %1, %66 : vector<8x128xf32>
    %c12 = arith.constant 12 : index
    %68 = memref.load %arg1[%c12] : memref<33xf32, #tpu.memory_space<smem>>
    %69 = vector.broadcast %68 : f32 to vector<8x128xf32>
    %70 = arith.mulf %3, %69 : vector<8x128xf32>
    %71 = arith.addf %67, %70 : vector<8x128xf32>
    %c20 = arith.constant 20 : index
    %72 = memref.load %arg1[%c20] : memref<33xf32, #tpu.memory_space<smem>>
    %73 = vector.broadcast %72 : f32 to vector<8x128xf32>
    %74 = arith.addf %71, %73 : vector<8x128xf32>
    %75 = math.tanh %74 : vector<8x128xf32>
    %c28 = arith.constant 28 : index
    %76 = memref.load %arg1[%c28] : memref<33xf32, #tpu.memory_space<smem>>
    %77 = vector.broadcast %76 : f32 to vector<8x128xf32>
    %78 = arith.mulf %75, %77 : vector<8x128xf32>
    %79 = arith.addf %64, %78 : vector<8x128xf32>
    %c5 = arith.constant 5 : index
    %80 = memref.load %arg1[%c5] : memref<33xf32, #tpu.memory_space<smem>>
    %81 = vector.broadcast %80 : f32 to vector<8x128xf32>
    %82 = arith.mulf %1, %81 : vector<8x128xf32>
    %c13 = arith.constant 13 : index
    %83 = memref.load %arg1[%c13] : memref<33xf32, #tpu.memory_space<smem>>
    %84 = vector.broadcast %83 : f32 to vector<8x128xf32>
    %85 = arith.mulf %3, %84 : vector<8x128xf32>
    %86 = arith.addf %82, %85 : vector<8x128xf32>
    %c21 = arith.constant 21 : index
    %87 = memref.load %arg1[%c21] : memref<33xf32, #tpu.memory_space<smem>>
    %88 = vector.broadcast %87 : f32 to vector<8x128xf32>
    %89 = arith.addf %86, %88 : vector<8x128xf32>
    %90 = math.tanh %89 : vector<8x128xf32>
    %c29 = arith.constant 29 : index
    %91 = memref.load %arg1[%c29] : memref<33xf32, #tpu.memory_space<smem>>
    %92 = vector.broadcast %91 : f32 to vector<8x128xf32>
    %93 = arith.mulf %90, %92 : vector<8x128xf32>
    %94 = arith.addf %79, %93 : vector<8x128xf32>
    %c6 = arith.constant 6 : index
    %95 = memref.load %arg1[%c6] : memref<33xf32, #tpu.memory_space<smem>>
    %96 = vector.broadcast %95 : f32 to vector<8x128xf32>
    %97 = arith.mulf %1, %96 : vector<8x128xf32>
    %c14 = arith.constant 14 : index
    %98 = memref.load %arg1[%c14] : memref<33xf32, #tpu.memory_space<smem>>
    %99 = vector.broadcast %98 : f32 to vector<8x128xf32>
    %100 = arith.mulf %3, %99 : vector<8x128xf32>
    %101 = arith.addf %97, %100 : vector<8x128xf32>
    %c22 = arith.constant 22 : index
    %102 = memref.load %arg1[%c22] : memref<33xf32, #tpu.memory_space<smem>>
    %103 = vector.broadcast %102 : f32 to vector<8x128xf32>
    %104 = arith.addf %101, %103 : vector<8x128xf32>
    %105 = math.tanh %104 : vector<8x128xf32>
    %c30 = arith.constant 30 : index
    %106 = memref.load %arg1[%c30] : memref<33xf32, #tpu.memory_space<smem>>
    %107 = vector.broadcast %106 : f32 to vector<8x128xf32>
    %108 = arith.mulf %105, %107 : vector<8x128xf32>
    %109 = arith.addf %94, %108 : vector<8x128xf32>
    %c7 = arith.constant 7 : index
    %110 = memref.load %arg1[%c7] : memref<33xf32, #tpu.memory_space<smem>>
    %111 = vector.broadcast %110 : f32 to vector<8x128xf32>
    %112 = arith.mulf %1, %111 : vector<8x128xf32>
    %c15 = arith.constant 15 : index
    %113 = memref.load %arg1[%c15] : memref<33xf32, #tpu.memory_space<smem>>
    %114 = vector.broadcast %113 : f32 to vector<8x128xf32>
    %115 = arith.mulf %3, %114 : vector<8x128xf32>
    %116 = arith.addf %112, %115 : vector<8x128xf32>
    %c23 = arith.constant 23 : index
    %117 = memref.load %arg1[%c23] : memref<33xf32, #tpu.memory_space<smem>>
    %118 = vector.broadcast %117 : f32 to vector<8x128xf32>
    %119 = arith.addf %116, %118 : vector<8x128xf32>
    %120 = math.tanh %119 : vector<8x128xf32>
    %c31 = arith.constant 31 : index
    %121 = memref.load %arg1[%c31] : memref<33xf32, #tpu.memory_space<smem>>
    %122 = vector.broadcast %121 : f32 to vector<8x128xf32>
    %123 = arith.mulf %120, %122 : vector<8x128xf32>
    %124 = arith.addf %109, %123 : vector<8x128xf32>
    %c32 = arith.constant 32 : index
    %125 = memref.load %arg1[%c32] : memref<33xf32, #tpu.memory_space<smem>>
    %126 = vector.broadcast %125 : f32 to vector<8x128xf32>
    %127 = arith.addf %124, %126 : vector<8x128xf32>
    %c0_6 = arith.constant 0 : index
    %c0_7 = arith.constant 0 : index
    %128 = vector.load %arg3[%c0_6, %c0_7] : memref<8x128xf32, #tpu.memory_space<vmem>>, vector<8x128xf32>
    tpu.vector_store %arg3[%c0_6, %c0_7], %127 {strides = array<i32>} : memref<8x128xf32, #tpu.memory_space<vmem>>, vector<8x128xf32>,
    return
  }
  func.func @transform_0(%arg0: i32) -> i32 {
    %c0_i32 = arith.constant 0 : i32
    %c0_i32_0 = arith.constant 0 : i32
    return %c0_i32 : i32
  }
  func.func @transform_1(%arg0: i32) -> (i32, i32, i32) {
    %c0_i32 = arith.constant 0 : i32
    %c0_i32_0 = arith.constant 0 : i32
    %c0_i32_1 = arith.constant 0 : i32
    return %c0_i32, %arg0, %c0_i32_0 : i32, i32, i32
  }
  func.func @transform_2(%arg0: i32) -> (i32, i32) {
    %c0_i32 = arith.constant 0 : i32
    %c0_i32_0 = arith.constant 0 : i32
    return %arg0, %c0_i32 : i32, i32
  }
}

</mosaic_0001>

<bundles_post_ra>
// kernel: tpu_custom_call.1
= control target key start
LH: loop header
LB: loop body
LE: loop exit
PB: predicated region body
PF: predicated region fallthrough
CT: control target
= control target key end

     0   :  { %7 = vsyncpa [#allocation5], 0  ;;  %s435_s0 = inlined_call_operand.hbm [shape: f32[33], index: 0, kind: input, shape index: {}]   ;;  %s436_s1 = inlined_call_operand.hbm [shape: f32[2,8,128], index: 1, kind: input, shape index: {}]   ;;  %s437_s2 = inlined_call_operand.hbm [shape: f32[8,128], index: 2, kind: output, shape index: {}]  }
   0x1   :  { %8 = vsyncpa [#allocation3], 0 }
   0x2   :  { %9 = vsyncpa [#allocation4], 0  ;;  %s233_s11 = scalar_lea.hbm %s435_s0, 16 }
   0x3   :  { %p234_p0 = scmp.ne.s32.totalorder %s435_s0, %s233_s11  ;;  %p237_p1 = scmp.lt.u32.totalorder %s233_s11, %s435_s0 }
   0x5   :  { %p239_p2 = pnand %p237_p1, %p234_p0 }
   0x7   :  { %242 = shalt.err (!%p239_p2)
}
   0x8   :  { %s293_s16 = smov [#allocation2]   ;;  %s294_s19 = smov [#allocation6]  }
   0x9   :  { %17 = dma.hbm_to_smem %s435_s0, 16, %s293_s16, [#allocation5]  }
   0xa   :  { %s23_s20 = sshll.u32 %s294_s19, 4  ;;  %s243_s23 = scalar_lea.hbm %s436_s1, 256  ;;  %s24_s20 = int_to_ptr.vmem [resolvable:$true] %s23_s20 }
   0xb   :  { %p244_p3 = scmp.ne.s32.totalorder %s436_s1, %s243_s23  ;;  %p247_p4 = scmp.lt.u32.totalorder %s243_s23, %s436_s1 }
   0xd   :  { %p249_p5 = pnand %p247_p4, %p244_p3 }
   0xf   :  { %252 = shalt.err (!%p249_p5)
}
  0x10   :  { %s253_s28 = scalar_lea.vmem %s24_s20, 256  ;;  %p258_p7 = scmp.lt.s32.totalorder %s24_s20, %s24_s20 }
  0x11   :  { %p254_p6 = scmp.ne.s32.totalorder %s24_s20, %s253_s28  ;;  %p259_p8 = scmp.lt.s32.totalorder %s253_s28, %s253_s28 }
  0x13   :  { %p260_p9 = por %p259_p8, %p258_p7 }
  0x15   :  { %p261_p10 = pnand %p260_p9, %p254_p6 }
  0x17   :  { %264 = shalt.err (!%p261_p10)
}
  0x18   :  { %s295_s0 = smov 128   ;;  %s296_s29 = smov 8  }
  0x19   :  { %29 = dma.hbm_to_vmem [thread:$0]  %s436_s1, 256, %s24_s20, [#allocation3], %s295_s0, %s295_s0, %s296_s29  }
  0x1a   :  { %287 = dma.done.wait [#allocation5], 16  }
  0x1b   :  { %288 = vsyncadd [#allocation5], 4294967280 }
  0x1c   :  { %289 = dma.done.wait [#allocation3], 256  }
  0x1d   :  { %290 = vsyncadd [#allocation3], 4294967040 }
  0x1e   :  { %36 = sfence }
  0x1f   :  { %s40_s4 = sld [smem:[#allocation2]]  ;;  %s183_s7 = sld [smem:[#allocation2 + $0x1]]  ;;  %v339_v0 = vld [vmem:[#allocation6] sm:$0xff]  ;;  %v341_v1 = vld [vmem:[#allocation6 + $0x8] sm:$0xff] }
  0x20   :  { %s180_s5 = sld [smem:[#allocation2 + $0x8]]  ;;  %s184_s8 = sld [smem:[#allocation2 + $0x9]] }
  0x21   :  { %s181_s6 = sld [smem:[#allocation2 + $0x10]]  ;;  %s337_s9 = sld [smem:[#allocation2 + $0x11]] }
  0x22   :  { %s187_s10 = sld [smem:[#allocation2 + $0x2]]  ;;  %s345_s1 = sld [smem:[#allocation2 + $0x3]] }
  0x23   :  { %s188_s11 = sld [smem:[#allocation2 + $0xa]]  ;;  %s347_s13 = sld [smem:[#allocation2 + $0xb]] }
  0x24   :  { %s343_s12 = sld [smem:[#allocation2 + $0x12]]  ;;  %s351_s14 = sld [smem:[#allocation2 + $0x13]] }
  0x25   :  { %v41_v2 = vstv %s40_s4  ;;  %v56_v7 = vstv %s183_s7  ;;  %s353_s15 = sld [smem:[#allocation2 + $0x4]]  ;;  %s362_s18 = sld [smem:[#allocation2 + $0x5]] }
  0x26   :  { %v44_v3 = vstv %s180_s5  ;;  %v42_v4 = vmul.f32 %v41_v2, %v339_v0  ;;  %v59_v8 = vstv %s184_s8  ;;  %s355_s16 = sld [smem:[#allocation2 + $0xc]]  ;;  %v57_v10 = vmul.f32 %v56_v7, %v339_v0  ;;  %s364_s19 = sld [smem:[#allocation2 + $0xd]] }
  0x27   :  { %v45_v5 = vmul.f32 %v44_v3, %v341_v1  ;;  %v48_v6 = vstv %s181_s6  ;;  %v60_v11 = vmul.f32 %v59_v8, %v341_v1  ;;  %s359_s17 = sld [smem:[#allocation2 + $0x14]]  ;;  %v63_v12 = vstv %s337_s9  ;;  %s366_s20 = sld [smem:[#allocation2 + $0x18]] }
  0x28   :  { %v71_v13 = vstv %s187_s10  ;;  %s370_s21 = sld [smem:[#allocation2 + $0x15]]  ;;  %v86_v20 = vstv %s345_s1  ;;  %s375_s22 = sld [smem:[#allocation2 + $0x6]] }
  0x29   :  { %v46_v9 = vadd.f32 %v45_v5, %v42_v4  ;;  %v74_v14 = vstv %s188_s11  ;;  %v61_v16 = vadd.f32 %v60_v11, %v57_v10  ;;  %v72_v17 = vmul.f32 %v71_v13, %v339_v0  ;;  %s377_s23 = sld [smem:[#allocation2 + $0xe]]  ;;  %s385_s25 = sld [smem:[#allocation2 + $0x7]] }
  0x2a   :  { %v75_v18 = vmul.f32 %v74_v14, %v341_v1  ;;  %v78_v19 = vstv %s343_s12  ;;  %v89_v21 = vstv %s347_s13  ;;  %v87_v24 = vmul.f32 %v86_v20, %v339_v0  ;;  %s380_s24 = sld [smem:[#allocation2 + $0x16]]  ;;  %s387_s26 = sld [smem:[#allocation2 + $0xf]] }
  0x2b   :  { %v49_v15 = vadd.f32 %v48_v6, %v46_v9  ;;  %v64_v22 = vadd.f32 %v63_v12, %v61_v16  ;;  %v90_v25 = vmul.f32 %v89_v21, %v341_v1  ;;  %v93_v26 = vstv %s351_s14  ;;  %s389_s27 = sld [smem:[#allocation2 + $0x19]]  ;;  %s393_s28 = sld [smem:[#allocation2 + $0x17]] }
  0x2c   :  { %v76_v23 = vadd.f32 %v75_v18, %v72_v17  ;;  %v101_v27 = vstv %s353_s15  ;;  %v104_v30 = vstv %s355_s16  ;;  %s396_s0 = sld [smem:[#allocation2 + $0x1a]]  ;;  %v116_v34 = vstv %s362_s18  ;;  %s407_s29 = sld [smem:[#allocation2 + $0x1b]] }
  0x2d   :  { %217 = vtanh.f32 %v49_v15  ;;  %v102_v29 = vmul.f32 %v101_v27, %v339_v0  ;;  %v91_v31 = vadd.f32 %v90_v25, %v87_v24  ;;  %v105_v32 = vmul.f32 %v104_v30, %v341_v1  ;;  %s414_s30 = sld [smem:[#allocation2 + $0x1c]]  ;;  %s202_s3 = sld [smem:[#allocation2 + $0x1d]] }
  0x2e   :  { %219 = vtanh.f32 %v64_v22  ;;  %v79_v28 = vadd.f32 %v78_v19, %v76_v23  ;;  %v108_v33 = vstv %s359_s17  ;;  %v119_v35 = vstv %s364_s19  ;;  %s206_s4 = sld [smem:[#allocation2 + $0x1e]]  ;;  %s210_s5 = sld [smem:[#allocation2 + $0x1f]] }
  0x2f   :  { %v94_v36 = vadd.f32 %v93_v26, %v91_v31  ;;  %v106_v37 = vadd.f32 %v105_v32, %v102_v29  ;;  %v117_v38 = vmul.f32 %v116_v34, %v339_v0  ;;  %v120_v39 = vmul.f32 %v119_v35, %v341_v1  ;;  %s211_s6 = sld [smem:[#allocation2 + $0x20]]  ;;  %s297_s7 = smov [#allocation7]  }
  0x30   :  { %221 = vtanh.f32 %v79_v28  ;;  %v52_v40 = vstv %s366_s20  ;;  %v123_v41 = vstv %s370_s21  ;;  %v131_v42 = vstv %s375_s22  ;;  %s170_s8 = sshll.u32 %s297_s7, 4  ;;  %s171_s8 = int_to_ptr.vmem [resolvable:$true] %s170_s8 }
  0x31   :  { %v134_v43 = vstv %s377_s23  ;;  %223 = vtanh.f32 %v94_v36  ;;  %v109_v44 = vadd.f32 %v108_v33, %v106_v37  ;;  %v121_v45 = vadd.f32 %v120_v39, %v117_v38  ;;  %s265_s9 = scalar_lea.vmem %s171_s8, 128  ;;  %p270_p12 = scmp.lt.s32.totalorder %s171_s8, %s171_s8 }
  0x32   :  { %v132_v46 = vmul.f32 %v131_v42, %v339_v0  ;;  %v135_v47 = vmul.f32 %v134_v43, %v341_v1  ;;  %v138_v48 = vstv %s380_s24  ;;  %v146_v49 = vstv %s385_s25  ;;  %p266_p11 = scmp.ne.s32.totalorder %s171_s8, %s265_s9  ;;  %p271_p13 = scmp.lt.s32.totalorder %s265_s9, %s265_s9 }
  0x33   :  { %v149_v50 = vstv %s387_s26  ;;  %225 = vtanh.f32 %v109_v44  ;;  %v124_v51 = vadd.f32 %v123_v41, %v121_v45  ;;  %v147_v52 = vmul.f32 %v146_v49, %v339_v0 }
  0x34   :  { %v150_v53 = vmul.f32 %v149_v50, %v341_v1  ;;  %v67_v55 = vstv %s389_s27  ;;  %v136_v56 = vadd.f32 %v135_v47, %v132_v46  ;;  %v153_v57 = vstv %s393_s28  ;;  %p272_p0 = por %p271_p13, %p270_p12 }
  0x35   :  { %227 = vtanh.f32 %v124_v51  ;;  %v82_v61 = vstv %s396_s0  ;;  %v97_v4 = vstv %s407_s29  ;;  %v112_v7 = vstv %s414_s30 }
  0x36   :  { %v151_v59 = vadd.f32 %v150_v53, %v147_v52  ;;  %v139_v62 = vadd.f32 %v138_v48, %v136_v56  ;;  %v127_v10 = vstv %s202_s3  ;;  %v142_v16 = vstv %s206_s4  ;;  %p273_p1 = pnand %p272_p0, %p266_p11 }
  0x37   :  { %v218_v54 = vpop.eup %217  ;;  %v157_v17 = vstv %s210_s5  ;;  %v161_v24 = vstv %s211_s6 }
  0x38   :  { %v53_v58 = vmul.f32 %v218_v54, %v52_v40  ;;  %v220_v60 = vpop.eup %219  ;;  %v154_v2 = vadd.f32 %v153_v57, %v151_v59  ;;  %229 = vtanh.f32 %v139_v62 }
  0x39   :  { %v68_v63 = vmul.f32 %v220_v60, %v67_v55 }
  0x3a   :  { %v222_v3 = vpop.eup %221  ;;  %231 = vtanh.f32 %v154_v2 }
  0x3b   :  { %v69_v0 = vadd.f32 %v68_v63, %v53_v58  ;;  %v83_v1 = vmul.f32 %v222_v3, %v82_v61  ;;  %v224_v5 = vpop.eup %223 }
  0x3c   :  { %v98_v8 = vmul.f32 %v224_v5, %v97_v4 }
  0x3d   :  { %v84_v6 = vadd.f32 %v83_v1, %v69_v0  ;;  %v226_v9 = vpop.eup %225 }
  0x3e   :  { %v113_v12 = vmul.f32 %v226_v9, %v112_v7 }
  0x3f   :  { %v99_v11 = vadd.f32 %v98_v8, %v84_v6  ;;  %v228_v13 = vpop.eup %227 }
  0x40   :  { %v128_v15 = vmul.f32 %v228_v13, %v127_v10 }
  0x41   :  { %v114_v14 = vadd.f32 %v113_v12, %v99_v11 }
  0x42   :  { %v230_v18 = vpop.eup %229 }
  0x43   :  { %v129_v19 = vadd.f32 %v128_v15, %v114_v14  ;;  %v143_v21 = vmul.f32 %v230_v18, %v142_v16 }
  0x44   :  { %v232_v20 = vpop.eup %231 }
  0x45   :  { %v158_v22 = vmul.f32 %v232_v20, %v157_v17  ;;  %v144_v23 = vadd.f32 %v143_v21, %v129_v19 }
  0x47   :  { %v159_v25 = vadd.f32 %v158_v22, %v144_v23 }
  0x49   :  { %v162_v26 = vadd.f32 %v161_v24, %v159_v25 }
  0x4b   :  { %163 = vst [vmem:[#allocation7] sm:$0xff] %v162_v26 }
  0x4c   :  { %276 = shalt.err (!%p273_p1)
}
  0x4d   :  { %s277_s12 = scalar_lea.hbm %s437_s2, 128 }
  0x4e   :  { %p278_p2 = scmp.ne.s32.totalorder %s437_s2, %s277_s12  ;;  %p281_p3 = scmp.lt.u32.totalorder %s277_s12, %s437_s2 }
  0x50   :  { %p283_p4 = pnand %p281_p3, %p278_p2 }
  0x52   :  { %286 = shalt.err (!%p283_p4)
}
  0x53   :  { %173 = dma.vmem_to_hbm [thread:$0]  %s171_s8, 128, %s437_s2, [#allocation4]  }
  0x54   :  { %291 = dma.done.wait [#allocation4], 128  }
  0x55   :  { %292 = vsyncadd [#allocation4], 4294967168 }
  0x56   :  { %177 = vsyncpa [#allocation3], 1 }
  0x57   :  { %178 = vsyncpa [#allocation4], 1 }
  0x58   :  { %179 = vsyncpa [#allocation5], 1 }

</bundles_post_ra>
